<compile_context>
chip_gen: v7x
topology: tpu7x:2x2x1
jax: 0.10.0
libtpu: 0.0.40
codegen_flags: <defaults>
</compile_context>

<pallas_src>
import jax
import jax.numpy as jnp
from jax import lax
from jax.experimental import pallas as pl
from jax.experimental.pallas import tpu as pltpu


def _attention_kernel(x_ref, v_ref, o_ref):
    # x_ref : VMEM (TB, N, H) f32  -- TB independent documents
    # v_ref : VMEM (1, H)     f32  -- folded direction W^T @ context
    # o_ref : VMEM (TB, H)    f32
    TB, N, H = x_ref.shape
    x3 = x_ref[...]                                    # (TB, N, H)
    v = v_ref[...]                                     # (1, H)

    # All logits of the block in one MXU call: (TB*N, H) x (H, 1) -> (TB*N, 1).
    # N == 8 == f32 sublane count, so this leading-dim merge is layout-free.
    xf = x3.reshape(TB * N, H)
    logits = lax.dot_general(
        xf, v, (((1,), (1,)), ((), ())),
        preferred_element_type=jnp.float32)            # (TB*N, 1)

    # Unshifted exp to match torch.exp / torch.sum (same overflow behavior as the
    # reference; the b.context shift was dropped because it cancels exactly).
    w3 = jnp.exp(logits).reshape(TB, N, 1)             # (TB, N, 1), layout-free reshape

    # Weighted per-document sum: VPU multiply + XLU sublane reduce over N=8.
    num = jnp.sum(x3 * w3, axis=1)                     # (TB, H)
    den = jnp.sum(w3, axis=1)                          # (TB, 1)

    o_ref[...] = num * pl.reciprocal(den, approx=False)


def attention_forward_batched(inputs, W, b, context, *, block_docs=512):
    """inputs: (B, N, H) f32; W: (H, H) [out, in] as nn.Linear; b: (H,); context: (H,).

    Returns (B, H): the module's forward applied independently to each document.
    `b` is accepted for API parity but unused: exp(b . context) cancels after
    normalization, so the result is identical to the PyTorch module.
    """
    B, N, H = inputs.shape

    # Fold Linear + context matvec:  logits = x @ (W^T c)   (b.c term cancels).
    v = jnp.dot(context, W, precision="highest").astype(jnp.float32)   # (H,)
    v_row = v.reshape(1, H)

    # Documents per block: multiple of 8 (sublane alignment of the (TB, H) output block).
    TB = min(block_docs, ((B + 7) // 8) * 8)
    TB = max(8, (TB // 8) * 8)
    Bp = ((B + TB - 1) // TB) * TB

    x = inputs.astype(jnp.float32)
    if Bp != B:
        # Zero documents are safe: logits=0 -> w=1 -> finite output; rows are sliced off.
        x = jnp.pad(x, ((0, Bp - B), (0, 0), (0, 0)))

    out = pl.pallas_call(
        _attention_kernel,
        out_shape=jax.ShapeDtypeStruct((Bp, H), jnp.float32),
        grid=(Bp // TB,),
        in_specs=[
            pl.BlockSpec((TB, N, H), lambda i: (i, 0, 0)),   # TB documents per step
            pl.BlockSpec((1, H), lambda i: (0, 0)),          # shared folded direction
        ],
        out_specs=pl.BlockSpec((TB, H), lambda i: (i, 0)),
        compiler_params=pltpu.CompilerParams(
            dimension_semantics=("parallel",),               # shard batch tiles across TCs
        ),
    )(x, v_row)

    return out[:B]


def attention_forward(inputs, W, b, context):
    """Module-parity entry point: inputs (1, N, H) -> (H,)."""
    return attention_forward_batched(inputs, W, b, context)[0]


def reference_forward(inputs, W, b, context):
    x = inputs.reshape(inputs.shape[1], -1)
    hidden = jnp.dot(x, W.T, precision="highest") + b
    w = jnp.exp(jnp.dot(hidden, context, precision="highest"))
    w = w / jnp.sum(w)
    return jnp.sum(x.T * w, axis=1)


if __name__ == "__main__":
    # Small shapes consistent with the module: seq N = 8, hidden H = 32.
    N, H = 8, 32
    init_weight = 0.08

    key = jax.random.PRNGKey(0)
    k_in, k_w, k_b, k_c, k_bat = jax.random.split(key, 5)

    inputs = jax.random.normal(k_in, (1, N, H), dtype=jnp.float32)
    # nn.Linear params re-initialized uniform(-init_weight, init_weight)
    W = jax.random.uniform(k_w, (H, H), jnp.float32, -init_weight, init_weight)
    b = jax.random.uniform(k_b, (H,), jnp.float32, -init_weight, init_weight)
    # context is a plain tensor (not re-initialized) -> torch.rand, i.e. U[0, 1)
    context = jax.random.uniform(k_c, (H,), jnp.float32, 0.0, 1.0)

    # Module-parity single-document forward.
    out = attention_forward(inputs, W, b, context)
    out = jax.block_until_ready(out)
    ref = reference_forward(inputs, W, b, context)
    assert out.shape == (H,), out.shape
    assert jnp.allclose(out, ref, atol=2e-5, rtol=2e-5), (out, ref)

    # Batched path: many independent documents per block; 2 grid steps ("parallel").
    B = 16
    batch = jax.random.normal(k_bat, (B, N, H), dtype=jnp.float32)
    out_b = jax.block_until_ready(
        attention_forward_batched(batch, W, b, context, block_docs=8))
    ref_b = jnp.stack(
        [reference_forward(batch[i:i + 1], W, b, context) for i in range(B)])
    assert out_b.shape == (B, H), out_b.shape
    assert jnp.allclose(out_b, ref_b, atol=2e-5, rtol=2e-5), (out_b, ref_b)

    print("KERNEL_OK")
</pallas_src>

<mosaic_0001>
module attributes {stable_mosaic.version = 11 : i64} {
  func.func @_attention_kernel(%arg0: i32, %arg1: memref<8x8x32xf32, #tpu.memory_space<vmem>>, %arg2: memref<1x32xf32, #tpu.memory_space<vmem>>, %arg3: memref<8x32xf32, #tpu.memory_space<vmem>>) attributes {dimension_semantics = [#tpu.dimension_semantics<parallel>], iteration_bounds = array<i64: 1>, scalar_prefetch = 0 : i64, scratch_operands = 0 : i64, tpu.core_type = #tpu.core_type<tc>, window_params = [{transform_indices = @transform_0, window_bounds = array<i64: 8, 8, 32>}, {pipeline_mode = #tpu.pipeline_mode<synchronous>, transform_indices = @transform_1, window_bounds = array<i64: 1, 32>}, {transform_indices = @transform_2, window_bounds = array<i64: 8, 32>}]} {
    %c0 = arith.constant 0 : index
    %c0_0 = arith.constant 0 : index
    %c0_1 = arith.constant 0 : index
    %0 = vector.load %arg1[%c0, %c0_0, %c0_1] : memref<8x8x32xf32, #tpu.memory_space<vmem>>, vector<8x8x32xf32>
    %c0_2 = arith.constant 0 : index
    %c0_3 = arith.constant 0 : index
    %1 = vector.load %arg2[%c0_2, %c0_3] : memref<1x32xf32, #tpu.memory_space<vmem>>, vector<1x32xf32>
    %2 = vector.shape_cast %0 : vector<8x8x32xf32> to vector<64x32xf32>
    %cst = arith.constant dense<0.000000e+00> : vector<64x1xf32>
    %3 = tpu.matmul %2, %1, %cst {dimension_numbers = #tpu.dot_dimension_numbers<[1], [1], [0], [0], [0, 0, 1, 0], [], []>} : vector<64x32xf32>, vector<1x32xf32>, vector<64x1xf32> -> vector<64x1xf32>
    %4 = math.exp %3 : vector<64x1xf32>
    %5 = vector.shape_cast %4 : vector<64x1xf32> to vector<8x8x1xf32>
    %6 = vector.broadcast %5 : vector<8x8x1xf32> to vector<8x8x32xf32>
    %7 = arith.mulf %0, %6 : vector<8x8x32xf32>
    %cst_4 = arith.constant dense<0.000000e+00> : vector<8x32xf32>
    %8 = vector.multi_reduction <add>, %7, %cst_4 [1] : vector<8x8x32xf32> to vector<8x32xf32>
    %cst_5 = arith.constant dense<0.000000e+00> : vector<8x1xf32>
    %9 = vector.multi_reduction <add>, %5, %cst_5 [1] : vector<8x8x1xf32> to vector<8x1xf32>
    %10 = tpu.reciprocal %9 : vector<8x1xf32> -> vector<8x1xf32>
    %11 = vector.broadcast %10 : vector<8x1xf32> to vector<8x32xf32>
    %12 = arith.mulf %8, %11 : vector<8x32xf32>
    %c0_6 = arith.constant 0 : index
    %c0_7 = arith.constant 0 : index
    %13 = vector.load %arg3[%c0_6, %c0_7] : memref<8x32xf32, #tpu.memory_space<vmem>>, vector<8x32xf32>
    tpu.vector_store %arg3[%c0_6, %c0_7], %12 {strides = array<i32>} : memref<8x32xf32, #tpu.memory_space<vmem>>, vector<8x32xf32>,
    return
  }
  func.func @transform_0(%arg0: i32) -> (i32, i32, i32) {
    %c0_i32 = arith.constant 0 : i32
    %c0_i32_0 = arith.constant 0 : i32
    %c0_i32_1 = arith.constant 0 : i32
    return %arg0, %c0_i32, %c0_i32_0 : i32, i32, i32
  }
  func.func @transform_1(%arg0: i32) -> (i32, i32) {
    %c0_i32 = arith.constant 0 : i32
    %c0_i32_0 = arith.constant 0 : i32
    %c0_i32_1 = arith.constant 0 : i32
    return %c0_i32, %c0_i32_0 : i32, i32
  }
  func.func @transform_2(%arg0: i32) -> (i32, i32) {
    %c0_i32 = arith.constant 0 : i32
    %c0_i32_0 = arith.constant 0 : i32
    return %arg0, %c0_i32 : i32, i32
  }
}

</mosaic_0001>

<bundles_post_ra>
// kernel: tpu_custom_call.1
= control target key start
LH: loop header
LB: loop body
LE: loop exit
PB: predicated region body
PF: predicated region fallthrough
CT: control target
= control target key end

     0   :  { %7 = vsyncpa [#allocation3], 0  ;;  %s433_s0 = inlined_call_operand.hbm [shape: f32[8,8,32], index: 0, kind: input, shape index: {}]   ;;  %s434_s1 = inlined_call_operand.vmem [shape: f32[1,32], index: 1, kind: input, shape index: {}]   ;;  %s435_s2 = inlined_call_operand.hbm [shape: f32[8,32], index: 2, kind: output, shape index: {}]  }
   0x1   :  { %8 = vsyncpa [#allocation4], 0  ;;  %s342_s9 = smov [#allocation2]   ;;  %s294_s13 = scalar_lea.hbm %s433_s0, 1024 }
   0x2   :  { %s14_s10 = sshll.u32 %s342_s9, 4  ;;  %p295_p0 = scmp.ne.s32.totalorder %s433_s0, %s294_s13  ;;  %s15_s10 = int_to_ptr.vmem [resolvable:$true] %s14_s10 }
   0x3   :  { %p298_p1 = scmp.lt.u32.totalorder %s294_s13, %s433_s0 }
   0x5   :  { %p300_p2 = pnand %p298_p1, %p295_p0 }
   0x7   :  { %303 = shalt.err (!%p300_p2)
}
   0x8   :  { %s304_s18 = scalar_lea.vmem %s15_s10, 1024  ;;  %p309_p4 = scmp.lt.s32.totalorder %s15_s10, %s15_s10 }
   0x9   :  { %p305_p3 = scmp.ne.s32.totalorder %s15_s10, %s304_s18  ;;  %p310_p5 = scmp.lt.s32.totalorder %s304_s18, %s304_s18 }
   0xb   :  { %p311_p6 = por %p310_p5, %p309_p4 }
   0xd   :  { %p312_p7 = pnand %p311_p6, %p305_p3 }
   0xf   :  { %315 = shalt.err (!%p312_p7)
}
  0x10   :  { %s343_s19 = smov 128   ;;  %s344_s20 = smov 8  }
  0x11   :  { %20 = dma.hbm_to_vmem [thread:$0]  %s433_s0, 1024, %s15_s10, [#allocation3], %s343_s19, %s343_s19, %s344_s20  }
  0x12   :  { %338 = dma.done.wait [#allocation3], 1024  }
  0x13   :  { %339 = vsyncadd [#allocation3], 4294966272  ;;  %v373_v0 = vld [vmem:[#allocation2 + $0x10] sm:$0xff]  ;;  %v257_v1 = vld [vmem:[%s434_s1] ss:$0 sm:$0xff]  ;;  %vm49_vm0 = vcmask 261120  }
  0x14   :  { %v26_v2 = vld [vmem:[#allocation2] sm:$0xff]  ;;  %v43_v3 = vmul.f32 %v257_v1, %v373_v0  ;;  %v379_v5 = vld [vmem:[#allocation2 + $0x18] sm:$0xff]  ;;  %v381_v6 = vld [vmem:[#allocation2 + $0x8] sm:$0xff]  ;;  %vm226_vm1 = vcmask 1041409   ;;  %vm228_vm2 = vcmask 1042434   ;;  %vm230_vm3 = vcmask 1043459  }
  0x15   :  { %v41_v4 = vmul.f32 %v257_v1, %v26_v2  ;;  %v44_v7 = vmul.f32 %v257_v1, %v379_v5  ;;  %v42_v8 = vmul.f32 %v257_v1, %v381_v6  ;;  %v385_v9 = vld [vmem:[#allocation2 + $0x28] sm:$0xff]  ;;  %v387_v10 = vld [vmem:[#allocation2 + $0x20] sm:$0xff]  ;;  %v395_v17 = vld [vmem:[#allocation2 + $0x38] sm:$0xff]  ;;  %vm232_vm4 = vcmask 1044484   ;;  %s345_s0 = smov [#allocation5]  }
  0x16   :  { %v56_v11 = vsel %vm49_vm0, %v43_v3, 0.0  ;;  %v46_v15 = vmul.f32 %v257_v1, %v385_v9  ;;  %v45_v16 = vmul.f32 %v257_v1, %v387_v10  ;;  %v397_v18 = vld [vmem:[#allocation2 + $0x30] sm:$0xff]  ;;  %v48_v21 = vmul.f32 %v257_v1, %v395_v17  ;;  %s248_s1 = sshll.u32 %s345_s0, 4  ;;  %s249_s1 = int_to_ptr.vmem [resolvable:$true] %s248_s1 }
  0x17   :  { %v50_v12 = vsel %vm49_vm0, %v41_v4, 0.0  ;;  %57 = vadd.xlane.f32.xlu1 %v56_v11  ;;  %v59_v13 = vsel %vm49_vm0, %v44_v7, 0.0  ;;  %v53_v14 = vsel %vm49_vm0, %v42_v8, 0.0  ;;  %v47_v22 = vmul.f32 %v257_v1, %v397_v18  ;;  %s316_s25 = scalar_lea.vmem %s249_s1, 128  ;;  %p321_p9 = scmp.lt.s32.totalorder %s249_s1, %s249_s1 }
  0x18   :  { %51 = vadd.xlane.f32.xlu0 %v50_v12  ;;  %v65_v19 = vsel %vm49_vm0, %v46_v15, 0.0  ;;  %v62_v20 = vsel %vm49_vm0, %v45_v16, 0.0  ;;  %v71_v23 = vsel %vm49_vm0, %v48_v21, 0.0  ;;  %vm234_vm5 = vcmask 1045509   ;;  %p317_p8 = scmp.ne.s32.totalorder %s249_s1, %s316_s25  ;;  %p322_p10 = scmp.lt.s32.totalorder %s316_s25, %s316_s25 }
  0x19   :  { %v68_v24 = vsel %vm49_vm0, %v47_v22, 0.0  ;;  %vm236_vm6 = vcmask 1046534   ;;  %vm238_vm7 = vcmask 1047559  }
  0x1a   :  { %p323_p11 = por %p322_p10, %p321_p9 }
  0x1b   :  { %60 = vadd.xlane.f32.xlu1 %v59_v13 }
  0x1c   :  { %54 = vadd.xlane.f32.xlu0 %v53_v14  ;;  %p324_p12 = pnand %p323_p11, %p317_p8 }
  0x1f   :  { %66 = vadd.xlane.f32.xlu1 %v65_v19 }
  0x20   :  { %63 = vadd.xlane.f32.xlu0 %v62_v20 }
  0x23   :  { %72 = vadd.xlane.f32.xlu1 %v71_v23 }
  0x24   :  { %69 = vadd.xlane.f32.xlu0 %v68_v24 }
  0xa4   :  { %v58_v25 = vpop.xlane.xlu1 %57 }
  0xa5   :  { %v52_v26 = vpop.xlane.xlu0 %51  ;;  %v78_v27 = vmul.f32 1.442695, %v58_v25 }
  0xa6   :  { %v74_v28 = vmul.f32 1.442695, %v52_v26 }
  0xa7   :  { %262 = vpow2.f32 %v78_v27 }
  0xa8   :  { %264 = vpow2.f32 %v74_v28  ;;  %v61_v29 = vpop.xlane.xlu1 %60 }
  0xa9   :  { %v55_v30 = vpop.xlane.xlu0 %54  ;;  %v80_v31 = vmul.f32 1.442695, %v61_v29 }
  0xaa   :  { %v76_v32 = vmul.f32 1.442695, %v55_v30 }
  0xab   :  { %266 = vpow2.f32 %v80_v31 }
  0xac   :  { %268 = vpow2.f32 %v76_v32  ;;  %v67_v33 = vpop.xlane.xlu1 %66 }
  0xad   :  { %v64_v34 = vpop.xlane.xlu0 %63  ;;  %v84_v35 = vmul.f32 1.442695, %v67_v33 }
  0xae   :  { %v82_v36 = vmul.f32 1.442695, %v64_v34 }
  0xaf   :  { %270 = vpow2.f32 %v84_v35 }
  0xb0   :  { %272 = vpow2.f32 %v82_v36  ;;  %v73_v37 = vpop.xlane.xlu1 %72 }
  0xb1   :  { %v70_v38 = vpop.xlane.xlu0 %69  ;;  %v263_v39 = vpop.eup %262  ;;  %v88_v43 = vmul.f32 1.442695, %v73_v37 }
  0xb2   :  { %v86_v40 = vmul.f32 1.442695, %v70_v38  ;;  %v265_v41 = vpop.eup %264  ;;  %v166_v42 = vrot.slane %v263_v39, 4  ;;  %v92_v51 = vmul.f32 %v263_v39, %v373_v0 }
  0xb3   :  { %v154_v44 = vrot.slane %v265_v41, 4  ;;  %v90_v47 = vmul.f32 %v265_v41, %v26_v2 }
  0xb4   :  { %v167_v45 = vadd.f32 %v263_v39, %v166_v42  ;;  %274 = vpow2.f32 %v86_v40  ;;  %v112_v0 = vsel %vm49_vm0, %v92_v51, 0.0 }
  0xb5   :  { %v267_v46 = vpop.eup %266  ;;  %v155_v48 = vadd.f32 %v265_v41, %v154_v44  ;;  %276 = vpow2.f32 %v88_v43  ;;  %v98_v58 = vsel %vm49_vm0, %v90_v47, 0.0  ;;  %v113_v16 = vrot.slane %v112_v0, 4 }
  0xb6   :  { %v269_v49 = vpop.eup %268  ;;  %v172_v50 = vrot.slane %v267_v46, 4  ;;  %v168_v55 = vrot.slane %v167_v45, 2  ;;  %v93_v63 = vmul.f32 %v267_v46, %v379_v5  ;;  %v99_v4 = vrot.slane %v98_v58, 4 }
  0xb7   :  { %v156_v52 = vrot.slane %v155_v48, 2  ;;  %v91_v53 = vmul.f32 %v269_v49, %v381_v6  ;;  %v160_v54 = vrot.slane %v269_v49, 4  ;;  %v114_v35 = vadd.f32 %v113_v16, %v112_v0 }
  0xb8   :  { %v173_v56 = vadd.f32 %v267_v46, %v172_v50  ;;  %v169_v3 = vadd.f32 %v168_v55, %v167_v45  ;;  %v119_v21 = vsel %vm49_vm0, %v93_v63, 0.0  ;;  %v100_v25 = vadd.f32 %v99_v4, %v98_v58 }
  0xb9   :  { %v271_v57 = vpop.eup %270  ;;  %v157_v59 = vadd.f32 %v156_v52, %v155_v48  ;;  %v105_v60 = vsel %vm49_vm0, %v91_v53, 0.0  ;;  %v161_v61 = vadd.f32 %v269_v49, %v160_v54  ;;  %v115_v49 = vrot.slane %v114_v35, 2 }
  0xba   :  { %v273_v62 = vpop.eup %272  ;;  %v174_v6 = vrot.slane %v173_v56, 2  ;;  %v106_v7 = vrot.slane %v105_v60, 4  ;;  %v184_v12 = vrot.slane %v271_v57, 4  ;;  %v95_v5 = vmul.f32 %v271_v57, %v385_v9 }
  0xbb   :  { %v162_v1 = vrot.slane %v161_v61, 2  ;;  %v178_v2 = vrot.slane %v273_v62, 4  ;;  %v158_v8 = vrot.slane %v157_v59, 1  ;;  %v94_v15 = vmul.f32 %v273_v62, %v387_v10 }
  0xbc   :  { %v170_v23 = vrot.slane %v169_v3, 1  ;;  %v175_v24 = vadd.f32 %v174_v6, %v173_v56  ;;  %v107_v26 = vadd.f32 %v106_v7, %v105_v60  ;;  %v185_v29 = vadd.f32 %v271_v57, %v184_v12 }
  0xbd   :  { %v163_v11 = vadd.f32 %v162_v1, %v161_v61  ;;  %v179_v13 = vadd.f32 %v273_v62, %v178_v2  ;;  %v159_v27 = vadd.f32 %v158_v8, %v157_v59  ;;  %v120_v10 = vrot.slane %v119_v21, 4 }
  0xbe   :  { %v275_v14 = vpop.eup %274  ;;  %v108_v32 = vrot.slane %v107_v26, 2  ;;  %v126_v33 = vsel %vm49_vm0, %v94_v15, 0.0  ;;  %v133_v36 = vsel %vm49_vm0, %v95_v5, 0.0  ;;  %v171_v37 = vadd.f32 %v170_v23, %v169_v3 }
  0xbf   :  { %v164_v19 = vrot.slane %v163_v11, 1  ;;  %v180_v20 = vrot.slane %v179_v13, 2  ;;  %v277_v22 = vpop.eup %276  ;;  %v96_v30 = vmul.f32 %v275_v14, %v397_v18  ;;  %v190_v31 = vrot.slane %v275_v14, 4 }
  0xc0   :  { %v97_v9 = vmul.f32 %v277_v22, %v395_v17  ;;  %v101_v38 = vrot.slane %v100_v25, 2  ;;  %v127_v39 = vrot.slane %v126_v33, 4  ;;  %v186_v40 = vrot.slane %v185_v29, 2 }
  0xc1   :  { %v165_v28 = vadd.f32 %v164_v19, %v163_v11  ;;  %v181_v34 = vadd.f32 %v180_v20, %v179_v13  ;;  %v109_v41 = vadd.f32 %v108_v32, %v107_v26  ;;  %v134_v42 = vrot.slane %v133_v36, 4 }
  0xc2   :  { %v140_v18 = vsel %vm49_vm0, %v96_v30, 0.0  ;;  %v176_v43 = vrot.slane %v175_v24, 1  ;;  %v191_v44 = vadd.f32 %v275_v14, %v190_v31  ;;  %v121_v45 = vadd.f32 %v120_v10, %v119_v21 }
  0xc3   :  { %278 = vrcp.f32 %v165_v28  ;;  %v196_v46 = vrot.slane %v277_v22, 4  ;;  %v141_v47 = vrot.slane %v140_v18, 4  ;;  %v147_v17 = vsel %vm49_vm0, %v97_v9, 0.0 }
  0xc4   :  { %280 = vrcp.f32 %v159_v27  ;;  %v182_v48 = vrot.slane %v181_v34, 1  ;;  %v128_v50 = vadd.f32 %v127_v39, %v126_v33  ;;  %v102_v51 = vadd.f32 %v101_v38, %v100_v25 }
  0xc5   :  { %282 = vrcp.f32 %v171_v37  ;;  %v110_v52 = vrot.slane %v109_v41, 1  ;;  %v135_v53 = vadd.f32 %v134_v42, %v133_v36  ;;  %v187_v54 = vadd.f32 %v186_v40, %v185_v29 }
  0xc6   :  { %v122_v55 = vrot.slane %v121_v45, 2  ;;  %v148_v56 = vrot.slane %v147_v17, 4  ;;  %v177_v57 = vadd.f32 %v176_v43, %v175_v24  ;;  %v192_v58 = vrot.slane %v191_v44, 2 }
  0xc7   :  { %v142_v59 = vadd.f32 %v141_v47, %v140_v18  ;;  %v183_v60 = vadd.f32 %v182_v48, %v181_v34  ;;  %v188_v61 = vrot.slane %v187_v54, 1  ;;  %v197_v62 = vadd.f32 %v277_v22, %v196_v46 }
  0xc8   :  { %v116_v63 = vadd.f32 %v115_v49, %v114_v35  ;;  %v129_v1 = vrot.slane %v128_v50, 2  ;;  %v193_v2 = vadd.f32 %v192_v58, %v191_v44  ;;  %v103_v0 = vrot.slane %v102_v51, 1 }
  0xc9   :  { %v136_v3 = vrot.slane %v135_v53, 2  ;;  %v189_v4 = vadd.f32 %v188_v61, %v187_v54  ;;  %v198_v6 = vrot.slane %v197_v62, 2  ;;  %v111_v8 = vadd.f32 %v110_v52, %v109_v41 }
  0xca   :  { %v149_v11 = vadd.f32 %v148_v56, %v147_v17  ;;  %v194_v12 = vrot.slane %v193_v2, 1  ;;  %284 = vrcp.f32 %v177_v57  ;;  %v123_v13 = vadd.f32 %v122_v55, %v121_v45 }
  0xcb   :  { %v143_v14 = vrot.slane %v142_v59, 2  ;;  %v199_v15 = vadd.f32 %v198_v6, %v197_v62  ;;  %286 = vrcp.f32 %v183_v60  ;;  %v117_v19 = vrot.slane %v116_v63, 1 }
  0xcc   :  { %v130_v20 = vadd.f32 %v129_v1, %v128_v50  ;;  %v195_v5 = vadd.f32 %v194_v12, %v193_v2  ;;  %288 = vrcp.f32 %v189_v4  ;;  %v104_v21 = vadd.f32 %v103_v0, %v102_v51 }
  0xcd   :  { %v279_v7 = vpop.eup %278  ;;  %v137_v22 = vadd.f32 %v136_v3, %v135_v53  ;;  %v200_v23 = vrot.slane %v199_v15, 1  ;;  %v150_v26 = vrot.slane %v149_v11, 2  ;;  %v124_v27 = vrot.slane %v123_v13, 1 }
  0xce   :  { %v281_v16 = vpop.eup %280  ;;  %v211_v24 = vmul.f32 %v279_v7, %v111_v8  ;;  %290 = vrcp.f32 %v195_v5  ;;  %v144_v28 = vadd.f32 %v143_v14, %v142_v59  ;;  %v118_v31 = vadd.f32 %v117_v19, %v116_v63 }
  0xcf   :  { %v283_v25 = vpop.eup %282  ;;  %v201_v29 = vadd.f32 %v200_v23, %v199_v15  ;;  %v210_v30 = vmul.f32 %v281_v16, %v104_v21  ;;  %v131_v32 = vrot.slane %v130_v20, 1  ;;  %v138_v10 = vrot.slane %v137_v22, 1 }
  0xd0   :  { %v151_v34 = vadd.f32 %v150_v26, %v149_v11  ;;  %v212_v9 = vmul.f32 %v283_v25, %v118_v31  ;;  %v125_v35 = vadd.f32 %v124_v27, %v123_v13  ;;  %v145_v36 = vrot.slane %v144_v28, 1 }
  0xd1   :  { %292 = vrcp.f32 %v201_v29  ;;  %v227_v33 = vsel %vm226_vm1, %v211_v24, %v210_v30  ;;  %v132_v38 = vadd.f32 %v131_v32, %v130_v20  ;;  %v139_v41 = vadd.f32 %v138_v10, %v137_v22 }
  0xd2   :  { %v229_v39 = vsel %vm228_vm2, %v212_v9, %v227_v33  ;;  %v152_v43 = vrot.slane %v151_v34, 1  ;;  %v146_v45 = vadd.f32 %v145_v36, %v144_v28 }
  0xd4   :  { %v285_v37 = vpop.eup %284  ;;  %v153_v50 = vadd.f32 %v152_v43, %v151_v34 }
  0xd5   :  { %v287_v40 = vpop.eup %286  ;;  %v213_v42 = vmul.f32 %v285_v37, %v125_v35 }
  0xd6   :  { %v289_v18 = vpop.eup %288  ;;  %v214_v44 = vmul.f32 %v287_v40, %v132_v38 }
  0xd7   :  { %v215_v46 = vmul.f32 %v289_v18, %v139_v41  ;;  %v231_v47 = vsel %vm230_vm3, %v213_v42, %v229_v39 }
  0xd8   :  { %v291_v17 = vpop.eup %290  ;;  %v233_v48 = vsel %vm232_vm4, %v214_v44, %v231_v47 }
  0xd9   :  { %v216_v49 = vmul.f32 %v291_v17, %v146_v45  ;;  %v235_v51 = vsel %vm234_vm5, %v215_v46, %v233_v48 }
  0xdb   :  { %v293_v52 = vpop.eup %292  ;;  %v237_v53 = vsel %vm236_vm6, %v216_v49, %v235_v51 }
  0xdc   :  { %v217_v54 = vmul.f32 %v293_v52, %v153_v50 }
  0xde   :  { %v239_v55 = vsel %vm238_vm7, %v217_v54, %v237_v53 }
  0xdf   :  { %241 = vst.msk [vmem:[#allocation5] sm:$0xff] %vm49_vm0, %v239_v55 }
  0xe0   :  { %327 = shalt.err (!%p324_p12)
}
  0xe1   :  { %s328_s28 = scalar_lea.hbm %s435_s2, 128 }
  0xe2   :  { %p329_p13 = scmp.ne.s32.totalorder %s435_s2, %s328_s28  ;;  %p332_p0 = scmp.lt.u32.totalorder %s328_s28, %s435_s2 }
  0xe4   :  { %p334_p1 = pnand %p332_p0, %p329_p13 }
  0xe6   :  { %337 = shalt.err (!%p334_p1)
}
  0xe7   :  { %251 = dma.vmem_to_hbm [thread:$0]  %s249_s1, 128, %s435_s2, [#allocation4]  }
  0xe8   :  { %340 = dma.done.wait [#allocation4], 128  }
  0xe9   :  { %341 = vsyncadd [#allocation4], 4294967168 }
  0xea   :  { %255 = vsyncpa [#allocation3], 1 }
  0xeb   :  { %256 = vsyncpa [#allocation4], 1 }

</bundles_post_ra>
